<compile_context>
chip_gen: v5e
topology: v5e:2x2
jax: 0.10.0
libtpu: 0.0.40
codegen_flags: <defaults>
</compile_context>

<pallas_src>
import jax
import jax.numpy as jnp
from jax import lax
from jax.experimental import pallas as pl
from jax.experimental.pallas import tpu as pltpu

# ---------------------------------------------------------------------------
# Config (small shapes consistent with the module's forward)
# ---------------------------------------------------------------------------
BATCH = 2
IN_CH = 4
SPATIAL = 16
BACKBONE_CH = 8
NUM_CLASSES = 16
EMBEDDING = 32
BN_EPS = 0.001
NORM_EPS = 1e-12        # F.normalize default eps

LANE = 128              # lane-dense padding for all kernel I/O
CLS_OFF = 64            # lanes [0:64)  -> embedding (only 0:32 used)
                        # lanes [64:128)-> classifier logits (only 64:80 used)
BIAS_ROW = BACKBONE_CH  # packed-weight row / feat lane carrying the constant 1
TM_CAP = 512            # batch-tile cap (keeps the live (TM,128) f32 tile in vregs)


def _round_up(x, m):
    return ((x + m - 1) // m) * m


def _choose_tm(b):
    """Batch tile: big enough to amortize per-step overhead, >=2 steps when
    the batch allows (v7x megacore), always a multiple of 8."""
    b_pad8 = _round_up(b, 8)
    tm = min(TM_CAP, b_pad8)
    if b_pad8 // tm < 2 and b_pad8 >= 16:   # keep 2 parallel grid steps for v7x
        tm = max(8, _round_up(b_pad8 // 2, 8))
    return tm


# ---------------------------------------------------------------------------
# Pallas kernel: ONE MXU matmul against the fully folded, packed weight, then
#   * L2-normalize the embedding half of the lanes (F.normalize, dim=1)
#   * pass the classifier half through untouched
# Biases ride inside the matmul via the constant-1 lane of `feat`.
# ---------------------------------------------------------------------------
def facenet_head_kernel(feat_ref, w_ref, out_ref):
    # [bn | cls] packed along lanes, biases included via the constant-1 lane  [MXU]
    acc = jnp.dot(feat_ref[...], w_ref[...], preferred_element_type=jnp.float32)

    lane = lax.broadcasted_iota(jnp.int32, acc.shape, 1)
    emb_mask = lane < CLS_OFF

    # F.normalize(p=2, dim=1): x * rsqrt(max(||x||^2, eps^2))            [XLU+EUP]
    emb = jnp.where(emb_mask, acc, 0.0)
    sq = jnp.sum(emb * emb, axis=1, keepdims=True)
    inv_norm = lax.rsqrt(jnp.maximum(sq, NORM_EPS * NORM_EPS))

    # lanes 0:64 -> normalized embedding, lanes 64:128 -> raw classifier logits
    out_ref[...] = jnp.where(emb_mask, acc * inv_norm, acc)


def facenet_head(feat, w_packed):
    """feat: (B, BACKBONE_CH) float32. Returns (x_norm (B,E), cls (B,Ncls))."""
    b, c = feat.shape
    tm = _choose_tm(b)
    b_pad = _round_up(b, tm)

    # pad activations to a lane-dense, sublane-aligned tile; the constant-1
    # lane (only for REAL rows) folds the bias into the matmul and keeps
    # padded rows exactly zero through the whole kernel.
    feat_p = jnp.zeros((b_pad, LANE), jnp.float32)
    feat_p = feat_p.at[:b, :c].set(feat)
    feat_p = feat_p.at[:b, BIAS_ROW].set(1.0)

    grid = (b_pad // tm,)
    out_p = pl.pallas_call(
        facenet_head_kernel,
        out_shape=jax.ShapeDtypeStruct((b_pad, LANE), jnp.float32),
        grid_spec=pltpu.PrefetchScalarGridSpec(
            num_scalar_prefetch=0,
            grid=grid,
            in_specs=[
                pl.BlockSpec((tm, LANE), lambda i: (i, 0)),    # feat tile
                pl.BlockSpec((LANE, LANE), lambda i: (0, 0)),  # packed fused weight
            ],
            out_specs=pl.BlockSpec((tm, LANE), lambda i: (i, 0)),
        ),
        compiler_params=pltpu.CompilerParams(
            dimension_semantics=("parallel",)),
    )(feat_p, w_packed)

    x_norm = out_p[:b, :EMBEDDING]
    cls = out_p[:b, CLS_OFF:CLS_OFF + NUM_CLASSES]
    return x_norm, cls


# ---------------------------------------------------------------------------
# One-time parameter preparation: fold BN + the whole affine chain (float32),
# pack bn/cls weights side-by-side in 128 lanes, put biases in a weight row.
# ---------------------------------------------------------------------------
def prepare_head_params(params):
    # BatchNorm1d (eval stats) folded into the bottleneck weight
    scale = params["bn_gamma"] * lax.rsqrt(params["bn_var"] + BN_EPS)   # (1, E)
    w_bn = params["w_bottleneck"] * scale                               # (N, E)
    bias_bn = params["bn_beta"] - params["bn_mean"] * scale             # (1, E)

    # fold the full affine chain: bn = feat @ W_bn_all + b_bn_all
    #                             cls = feat @ W_cls_all + b_cls_all
    w_bn_all = params["w_fc"] @ w_bn                                    # (C, E)
    b_bn_all = params["b_fc"][None, :] @ w_bn + bias_bn                 # (1, E)
    w_cls_all = w_bn_all @ params["w_cls"]                              # (C, Ncls)
    b_cls_all = b_bn_all @ params["w_cls"] + params["b_cls"]            # (1, Ncls)

    w = jnp.zeros((LANE, LANE), jnp.float32)
    w = w.at[:BACKBONE_CH, :EMBEDDING].set(w_bn_all)
    w = w.at[:BACKBONE_CH, CLS_OFF:CLS_OFF + NUM_CLASSES].set(w_cls_all)
    # bias row, hit by the constant-1 lane of feat
    w = w.at[BIAS_ROW, :EMBEDDING].set(b_bn_all[0])
    w = w.at[BIAS_ROW, CLS_OFF:CLS_OFF + NUM_CLASSES].set(b_cls_all[0])
    return w


# ---------------------------------------------------------------------------
# Deterministic stand-in backbone (plain JAX glue) -- NCHW convs + GAP.
# Returns the same structure as Teacher / CNN_RIS up to `feat`; the final FC
# producing `x` is folded into the Pallas head weight.
# ---------------------------------------------------------------------------
def conv_nchw(x, w):
    return lax.conv_general_dilated(
        x, w, window_strides=(1, 1), padding="SAME",
        dimension_numbers=("NCHW", "OIHW", "NCHW"))


def backbone_features(x, params):
    rb1 = jax.nn.relu(conv_nchw(x, params["conv1"]))
    rb2 = jax.nn.relu(conv_nchw(rb1, params["conv2"]))
    rb3 = jax.nn.relu(conv_nchw(rb2, params["conv3"]))
    feat = jnp.mean(rb3, axis=(2, 3))          # global average pool -> (B, C)
    mimic = feat
    return rb1, rb2, rb3, feat, mimic


# ---------------------------------------------------------------------------
# Facenet forward (mirrors the PyTorch forward)
# ---------------------------------------------------------------------------
def facenet_forward(x, params, head_w, mode="predict"):
    rb1, rb2, rb3, feat, mimic = backbone_features(x, params)
    # TODO(synk): Dropout and batch-statistics BN are not applied in 'train'
    #             mode; the head uses eval semantics (identity dropout,
    #             running BN stats), matching inference behaviour.
    x_norm, cls = facenet_head(feat, head_w)
    if mode == "predict":
        return x_norm
    return feat, mimic, x_norm, cls


# ---------------------------------------------------------------------------
# Pure-JAX reference for the head (unfused, unpadded) -- correctness check.
# ---------------------------------------------------------------------------
def facenet_head_ref(feat, params):
    h = feat @ params["w_fc"] + params["b_fc"]
    emb = h @ params["w_bottleneck"]
    inv_std = 1.0 / jnp.sqrt(params["bn_var"] + BN_EPS)
    bn = (emb - params["bn_mean"]) * inv_std * params["bn_gamma"] + params["bn_beta"]
    norm = jnp.maximum(jnp.sqrt(jnp.sum(bn * bn, axis=1, keepdims=True)), NORM_EPS)
    x_norm = bn / norm
    cls = bn @ params["w_cls"] + params["b_cls"]
    return x_norm, cls


# ---------------------------------------------------------------------------
# Deterministic parameter initialization
# ---------------------------------------------------------------------------
def init_params(key):
    ks = jax.random.split(key, 8)
    p = {
        # backbone stand-in
        "conv1": 0.1 * jax.random.normal(ks[0], (BACKBONE_CH, IN_CH, 3, 3), jnp.float32),
        "conv2": 0.1 * jax.random.normal(ks[1], (BACKBONE_CH, BACKBONE_CH, 3, 3), jnp.float32),
        "conv3": 0.1 * jax.random.normal(ks[2], (BACKBONE_CH, BACKBONE_CH, 3, 3), jnp.float32),
        "w_fc": 0.1 * jax.random.normal(ks[3], (BACKBONE_CH, NUM_CLASSES), jnp.float32),
        "b_fc": jnp.zeros((NUM_CLASSES,), jnp.float32),
        # Facenet head
        "w_bottleneck": 0.1 * jax.random.normal(ks[4], (NUM_CLASSES, EMBEDDING), jnp.float32),
        "bn_gamma": jnp.ones((1, EMBEDDING), jnp.float32),
        "bn_beta": jnp.zeros((1, EMBEDDING), jnp.float32),
        "bn_mean": jnp.zeros((1, EMBEDDING), jnp.float32),
        "bn_var": jnp.ones((1, EMBEDDING), jnp.float32),
        "w_cls": 0.1 * jax.random.normal(ks[5], (EMBEDDING, NUM_CLASSES), jnp.float32),
        "b_cls": jnp.zeros((1, NUM_CLASSES), jnp.float32),
    }
    return p


if __name__ == "__main__":
    key = jax.random.PRNGKey(0)
    params = init_params(key)
    head_w = prepare_head_params(params)
    x = jax.random.normal(jax.random.PRNGKey(1), (BATCH, IN_CH, SPATIAL, SPATIAL),
                          jnp.float32)

    # predict path
    predict_fn = jax.jit(lambda xx: facenet_forward(xx, params, head_w,
                                                    mode="predict"))
    emb = jax.block_until_ready(predict_fn(x))

    # train path (feat, mimic, x_norm, cls)
    train_fn = jax.jit(lambda xx: facenet_forward(xx, params, head_w,
                                                  mode="train"))
    feat, mimic, x_norm, cls = train_fn(x)
    jax.block_until_ready(cls)

    assert emb.shape == (BATCH, EMBEDDING)
    assert cls.shape == (BATCH, NUM_CLASSES)

    # L2-normalized rows should have unit norm
    norms = jnp.linalg.norm(emb, axis=1)
    assert jnp.allclose(norms, 1.0, atol=1e-4)

    # match the unfused pure-JAX reference head
    xn_ref, cls_ref = facenet_head_ref(feat, params)
    assert jnp.allclose(x_norm, xn_ref, atol=1e-4, rtol=1e-4)
    assert jnp.allclose(cls, cls_ref, atol=1e-4, rtol=1e-4)

    print("KERNEL_OK")
</pallas_src>

<mosaic_0001>
module attributes {stable_mosaic.version = 11 : i64} {
  func.func @facenet_head_kernel(%arg0: i32, %arg1: memref<8x128xf32, #tpu.memory_space<vmem>>, %arg2: memref<128x128xf32, #tpu.memory_space<vmem>>, %arg3: memref<8x128xf32, #tpu.memory_space<vmem>>) attributes {dimension_semantics = [#tpu.dimension_semantics<parallel>], iteration_bounds = array<i64: 1>, scalar_prefetch = 0 : i64, scratch_operands = 0 : i64, tpu.core_type = #tpu.core_type<tc>, window_params = [{transform_indices = @transform_0, window_bounds = array<i64: 8, 128>}, {pipeline_mode = #tpu.pipeline_mode<synchronous>, transform_indices = @transform_1, window_bounds = array<i64: 128, 128>}, {transform_indices = @transform_2, window_bounds = array<i64: 8, 128>}]} {
    %c0 = arith.constant 0 : index
    %c0_0 = arith.constant 0 : index
    %0 = vector.load %arg1[%c0, %c0_0] : memref<8x128xf32, #tpu.memory_space<vmem>>, vector<8x128xf32>
    %c0_1 = arith.constant 0 : index
    %c0_2 = arith.constant 0 : index
    %1 = vector.load %arg2[%c0_1, %c0_2] : memref<128x128xf32, #tpu.memory_space<vmem>>, vector<128x128xf32>
    %cst = arith.constant dense<0.000000e+00> : vector<8x128xf32>
    %2 = tpu.matmul %0, %1, %cst {dimension_numbers = #tpu.dot_dimension_numbers<[1], [0], [0], [1], [0, 0, 1, 1], [], []>} : vector<8x128xf32>, vector<128x128xf32>, vector<8x128xf32> -> vector<8x128xf32>
    %3 = tpu.iota {dimensions = array<i32: 1>} : vector<8x128xi32>
    %c64_i32 = arith.constant 64 : i32
    %4 = vector.broadcast %c64_i32 : i32 to vector<8x128xi32>
    %5 = arith.cmpi slt, %3, %4 : vector<8x128xi32>
    %cst_3 = arith.constant 0.000000e+00 : f32
    %6 = vector.broadcast %cst_3 : f32 to vector<8x128xf32>
    %7 = arith.select %5, %2, %6 : vector<8x128xi1>, vector<8x128xf32>
    %8 = arith.mulf %7, %7 : vector<8x128xf32>
    %cst_4 = arith.constant dense<0.000000e+00> : vector<8xf32>
    %9 = vector.multi_reduction <add>, %8, %cst_4 [1] : vector<8x128xf32> to vector<8xf32>
    %10 = vector.shape_cast %9 : vector<8xf32> to vector<8x1xf32>
    %cst_5 = arith.constant 1.000000e-24 : f32
    %11 = vector.broadcast %cst_5 : f32 to vector<8x1xf32>
    %12 = arith.maximumf %10, %11 : vector<8x1xf32>
    %13 = math.rsqrt %12 : vector<8x1xf32>
    %14 = vector.broadcast %13 : vector<8x1xf32> to vector<8x128xf32>
    %15 = arith.mulf %2, %14 : vector<8x128xf32>
    %16 = arith.select %5, %15, %2 : vector<8x128xi1>, vector<8x128xf32>
    %c0_6 = arith.constant 0 : index
    %c0_7 = arith.constant 0 : index
    %17 = vector.load %arg3[%c0_6, %c0_7] : memref<8x128xf32, #tpu.memory_space<vmem>>, vector<8x128xf32>
    tpu.vector_store %arg3[%c0_6, %c0_7], %16 {strides = array<i32>} : memref<8x128xf32, #tpu.memory_space<vmem>>, vector<8x128xf32>,
    return
  }
  func.func @transform_0(%arg0: i32) -> (i32, i32) {
    %c0_i32 = arith.constant 0 : i32
    %c0_i32_0 = arith.constant 0 : i32
    return %arg0, %c0_i32 : i32, i32
  }
  func.func @transform_1(%arg0: i32) -> (i32, i32) {
    %c0_i32 = arith.constant 0 : i32
    %c0_i32_0 = arith.constant 0 : i32
    %c0_i32_1 = arith.constant 0 : i32
    return %c0_i32, %c0_i32_0 : i32, i32
  }
  func.func @transform_2(%arg0: i32) -> (i32, i32) {
    %c0_i32 = arith.constant 0 : i32
    %c0_i32_0 = arith.constant 0 : i32
    return %arg0, %c0_i32 : i32, i32
  }
}

</mosaic_0001>

<bundles_post_ra>
// kernel: _lambda_.1
= control target key start
LH: loop header
LB: loop body
LE: loop exit
PB: predicated region body
PF: predicated region fallthrough
CT: control target
= control target key end

     0   :  { %v48_v17 = vlaneseq  ;;  %s146_s1 = inlined_call_operand.vmem [shape: f32[128,128], index: 1, kind: input, shape index: {}]   ;;  %s147_s0 = inlined_call_operand.vmem [shape: f32[8,128], index: 0, kind: input, shape index: {}]   ;;  %s148_s2 = inlined_call_operand.vmem [shape: f32[8,128], index: 2, kind: output, shape index: {}]  }
   0x1   :  { %v27_v0 = vld [vmem:[%s146_s1 + $0x78] sm:$0xff]  ;;  %v26_v1 = vld [vmem:[%s146_s1 + $0x70] sm:$0xff]  ;;  %v25_v2 = vld [vmem:[%s146_s1 + $0x68] sm:$0xff] }
   0x2   :  { %28 = vmatpush.msra.mxu0 %v27_v0  ;;  %v24_v3 = vld [vmem:[%s146_s1 + $0x60] sm:$0xff]  ;;  %v23_v4 = vld [vmem:[%s146_s1 + $0x58] sm:$0xff]  ;;  %v22_v5 = vld [vmem:[%s146_s1 + $0x50] sm:$0xff]  ;;  %v49_v18 = vand.u32 127, %v48_v17 }
   0x3   :  { %v21_v6 = vld [vmem:[%s146_s1 + $0x48] sm:$0xff]  ;;  %v20_v7 = vld [vmem:[%s146_s1 + $0x40] sm:$0xff]  ;;  %v19_v8 = vld [vmem:[%s146_s1 + $0x38] sm:$0xff] }
   0x4   :  { %29 = vmatpush.msra.mxu0 %v26_v1  ;;  %v18_v9 = vld [vmem:[%s146_s1 + $0x30] sm:$0xff]  ;;  %v17_v10 = vld [vmem:[%s146_s1 + $0x28] sm:$0xff]  ;;  %v16_v11 = vld [vmem:[%s146_s1 + $0x20] sm:$0xff]  ;;  %vm50_vm0 = vcmp.lt.s32.totalorder %v49_v18, 64 }
   0x5   :  { %v15_v12 = vld [vmem:[%s146_s1 + $0x18] sm:$0xff]  ;;  %v14_v13 = vld [vmem:[%s146_s1 + $0x10] sm:$0xff]  ;;  %v13_v14 = vld [vmem:[%s146_s1 + $0x8] sm:$0xff] }
   0x6   :  { %30 = vmatpush.msra.mxu0 %v25_v2  ;;  %v12_v15 = vld [vmem:[%s146_s1] sm:$0xff] }
   0x7   :  { %v11_v16 = vld [vmem:[%s147_s0] sm:$0xff] }
   0x8   :  { %31 = vmatpush.msra.mxu0 %v24_v3 }
   0xa   :  { %32 = vmatpush.msra.mxu0 %v23_v4 }
   0xc   :  { %33 = vmatpush.msra.mxu0 %v22_v5 }
   0xe   :  { %34 = vmatpush.msra.mxu0 %v21_v6 }
  0x10   :  { %35 = vmatpush.msra.mxu0 %v20_v7 }
  0x12   :  { %36 = vmatpush.msra.mxu0 %v19_v8 }
  0x14   :  { %37 = vmatpush.msra.mxu0 %v18_v9 }
  0x16   :  { %38 = vmatpush.msra.mxu0 %v17_v10 }
  0x18   :  { %39 = vmatpush.msra.mxu0 %v16_v11 }
  0x1a   :  { %40 = vmatpush.msra.mxu0 %v15_v12 }
  0x1c   :  { %41 = vmatpush.msra.mxu0 %v14_v13 }
  0x1e   :  { %42 = vmatpush.msra.mxu0 %v13_v14 }
  0x20   :  { %43 = vmatpush.msra.mxu0 %v12_v15 }
  0x21   :  { %44 = vmatmul.f32.vlgmr.msra.gmra.mxu0 %v11_v16 }
  0x9e   :  { %v45_v19 = vpop.f32.mrf.mxu0 }
  0x9f   :  { %v51_v20 = vsel %vm50_vm0, %v45_v19, 0.0 }
  0xa0   :  { %v52_v21 = vmul.f32 %v51_v20, %v51_v20 }
  0xa2   :  { %53 = vadd.xlane.f32.xlu0 %v52_v21 }
 0x115   :  { %v54_v22 = vpop.xlane.xlu0 %53 }
 0x116   :  { %v55_v23 = vmax.f32 %v54_v22, 1e-24 }
 0x118   :  { %73 = vrsqrt.f32 %v55_v23  ;;  %vm62_vm2 = vweird.f32 %v55_v23 }
 0x11e   :  { %v74_v24 = vpop.eup %73 }
 0x11f   :  { %v57_v25 = vmul.f32 %v74_v24, %v55_v23  ;;  %vm63_vm1 = vweird.f32 %v74_v24 }
 0x120   :  { %vm64_vm3 = vmor %vm62_vm2, %vm63_vm1 }
 0x121   :  { %v58_v26 = vmul.f32 %v74_v24, %v57_v25 }
 0x123   :  { %v59_v27 = vmul.f32 0.5, %v58_v26 }
 0x125   :  { %v60_v28 = vsub.f32 1.5, %v59_v27 }
 0x127   :  { %v61_v29 = vmul.f32 %v74_v24, %v60_v28 }
 0x129   :  { %v65_v30 = vsel %vm64_vm3, %v74_v24, %v61_v29 }
 0x12a   :  { %v66_v31 = vmul.f32 %v65_v30, %v45_v19 }
 0x12c   :  { %v67_v32 = vsel %vm50_vm0, %v66_v31, %v45_v19 }
 0x12d   :  { %68 = vst [vmem:[%s148_s2] sm:$0xff] %v67_v32 }

</bundles_post_ra>
